<compile_context>
chip_gen: v7x
topology: tpu7x:2x2x1
jax: 0.10.0
libtpu: 0.0.40
codegen_flags: <defaults>
</compile_context>

<pallas_src>
import functools

import jax
import jax.numpy as jnp
from jax import lax
from jax.experimental import pallas as pl
from jax.experimental.pallas import tpu as pltpu


def _round_up(a: int, b: int) -> int:
    return (a + b - 1) // b * b


def _mlp_kernel(x_ref, w1_ref, b1_ref, w2_ref, b2_ref, o_ref, *, mxu_dtype):
    # x_ref: (tm, C) f32 | w1: (C, H) mxu_dtype | b1: (1, H) f32
    # w2: (H, O_pad) mxu_dtype | b2: (1, O_pad) f32 | o_ref: (tm, O_pad) f32
    x = x_ref[...].astype(mxu_dtype)
    h = jnp.dot(x, w1_ref[...], preferred_element_type=jnp.float32)
    h = h + b1_ref[...]
    # Exact (erf-based) GELU in f32 -- matches torch.nn.GELU() default.
    h = 0.5 * h * (1.0 + lax.erf(h * 0.7071067811865476))
    # drop1: p=0.0 -> identity
    o = jnp.dot(h.astype(mxu_dtype), w2_ref[...],
                preferred_element_type=jnp.float32)
    o = o + b2_ref[...]
    # drop2: p=0.0 -> identity
    o_ref[...] = o.astype(o_ref.dtype)


@functools.partial(
    jax.jit, static_argnames=("tm", "mxu_dtype", "single_buffer_weights"))
def _mlp_pallas(x, w1, b1, w2, b2, *, tm, mxu_dtype, single_buffer_weights):
    """x: (B, N, C). w1: (C, H), b1: (H,), w2: (H, O), b2: (O,)."""
    B, N, C = x.shape
    H = w1.shape[1]
    O = w2.shape[1]
    M = B * N

    # Token tile: big enough to fill the MXU, but don't over-pad tiny inputs.
    tm_eff = min(tm, _round_up(M, 8))
    M_pad = _round_up(M, tm_eff)
    # Lane-dense output: pad out_features to a multiple of 128 (unmasked vst).
    O_pad = _round_up(O, 128)

    x2 = x.reshape(M, C)
    if M_pad != M:
        x2 = jnp.pad(x2, ((0, M_pad - M), (0, 0)))

    w1c = w1.astype(mxu_dtype)
    w2c = w2.astype(mxu_dtype)
    b2p = b2.astype(jnp.float32)
    if O_pad != O:
        w2c = jnp.pad(w2c, ((0, 0), (0, O_pad - O)))
        b2p = jnp.pad(b2p, (0, O_pad - O))
    b1r = b1.astype(jnp.float32).reshape(1, H)
    b2r = b2p.reshape(1, O_pad)

    grid = (M_pad // tm_eff,)

    # Resident (constant index_map) operands: single-buffer them if possible.
    if single_buffer_weights:
        def wspec(shape):
            return pl.BlockSpec(shape, lambda i: (0, 0),
                                pipeline_mode=pl.Buffered(1))
    else:
        def wspec(shape):
            return pl.BlockSpec(shape, lambda i: (0, 0))

    # Explicit VMEM budget: double-buffered activation tiles + single-buffered
    # resident weights/biases + f32 intermediates, with generous headroom.
    act_b = jnp.dtype(x.dtype).itemsize
    w_b = jnp.dtype(mxu_dtype).itemsize
    vmem_bytes = (
        2 * tm_eff * C * act_b          # input tiles (double-buffered)
        + 2 * tm_eff * O_pad * act_b    # output tiles (double-buffered)
        + (C * H + H * O_pad) * w_b     # resident weights
        + (H + O_pad) * 4               # resident biases (f32)
        + tm_eff * (H + O_pad) * 4      # f32 hidden activations + accumulator
    )
    vmem_limit = min(max(int(vmem_bytes * 1.5) + (2 << 20), 32 << 20),
                     100 << 20)

    out2 = pl.pallas_call(
        functools.partial(_mlp_kernel, mxu_dtype=mxu_dtype),
        out_shape=jax.ShapeDtypeStruct((M_pad, O_pad), x.dtype),
        grid_spec=pltpu.PrefetchScalarGridSpec(
            num_scalar_prefetch=0,
            grid=grid,
            in_specs=[
                pl.BlockSpec((tm_eff, C), lambda i: (i, 0)),  # x tile
                wspec((C, H)),                                # W1 (resident)
                wspec((1, H)),                                # b1 (resident)
                wspec((H, O_pad)),                            # W2 (resident)
                wspec((1, O_pad)),                            # b2 (resident)
            ],
            out_specs=pl.BlockSpec((tm_eff, O_pad), lambda i: (i, 0)),
        ),
        compiler_params=pltpu.CompilerParams(
            dimension_semantics=("parallel",),
            vmem_limit_bytes=vmem_limit,
        ),
    )(x2, w1c, b1r, w2c, b2r)

    return out2[:M, :O].reshape(B, N, O)


_BUFFERED_1_OK = None  # lazily probed: does this build accept pl.Buffered(1)?


def mlp_pallas(x, w1, b1, w2, b2, *, tm=256, mxu_dtype=jnp.bfloat16):
    """Fused MLP forward: (B, N, in_features) -> (B, N, out_features)."""
    global _BUFFERED_1_OK
    if _BUFFERED_1_OK is None:
        try:
            out = jax.block_until_ready(
                _mlp_pallas(x, w1, b1, w2, b2, tm=tm, mxu_dtype=mxu_dtype,
                            single_buffer_weights=True))
            _BUFFERED_1_OK = True
            return out
        except Exception:
            # Fall back to default (double-buffered) resident weight specs if
            # pipeline_mode=pl.Buffered(1) is rejected by this jax build.
            _BUFFERED_1_OK = False
    return _mlp_pallas(x, w1, b1, w2, b2, tm=tm, mxu_dtype=mxu_dtype,
                       single_buffer_weights=_BUFFERED_1_OK)


def mlp_ref(x, w1, b1, w2, b2):
    h = jnp.einsum("bnc,ch->bnh", x, w1) + b1
    h = 0.5 * h * (1.0 + lax.erf(h / jnp.sqrt(2.0)))
    return jnp.einsum("bnh,ho->bno", h, w2) + b2


def _make_inputs(key, B, N, C, H, O):
    kx, kw1, kb1, kw2, kb2 = jax.random.split(key, 5)
    x = jax.random.normal(kx, (B, N, C), dtype=jnp.float32)
    w1 = jax.random.normal(kw1, (C, H), dtype=jnp.float32) * 0.05
    b1 = jax.random.normal(kb1, (H,), dtype=jnp.float32) * 0.05
    w2 = jax.random.normal(kw2, (H, O), dtype=jnp.float32) * 0.05
    b2 = jax.random.normal(kb2, (O,), dtype=jnp.float32) * 0.05
    return x, w1, b1, w2, b2


if __name__ == "__main__":
    key = jax.random.PRNGKey(0)
    k1, k2 = jax.random.split(key)

    # Case 1: tiny shapes from the module's forward
    # (batch=2, seq=8, in=32, hidden=64, out=32).
    x, w1, b1, w2, b2 = _make_inputs(k1, B=2, N=8, C=32, H=64, O=32)
    ref = mlp_ref(x, w1, b1, w2, b2)

    out_f32 = jax.block_until_ready(
        mlp_pallas(x, w1, b1, w2, b2, mxu_dtype=jnp.float32))
    assert out_f32.shape == ref.shape
    assert jnp.allclose(out_f32, ref, atol=1e-4, rtol=1e-4)

    out_bf16 = jax.block_until_ready(mlp_pallas(x, w1, b1, w2, b2))
    assert jnp.allclose(out_bf16, ref, atol=5e-2, rtol=5e-2)

    # Case 2: exercises M-padding (400 tokens, tile 256 -> 2 grid steps) and
    # out_features padding to the 128-lane width.
    x, w1, b1, w2, b2 = _make_inputs(k2, B=2, N=200, C=64, H=128, O=96)
    ref = mlp_ref(x, w1, b1, w2, b2)

    out_f32 = jax.block_until_ready(
        mlp_pallas(x, w1, b1, w2, b2, mxu_dtype=jnp.float32))
    assert out_f32.shape == ref.shape
    assert jnp.allclose(out_f32, ref, atol=1e-4, rtol=1e-4)

    out_bf16 = jax.block_until_ready(mlp_pallas(x, w1, b1, w2, b2))
    assert jnp.allclose(out_bf16, ref, atol=5e-2, rtol=5e-2)

    print("KERNEL_OK")
</pallas_src>

<mosaic_0001>
module attributes {stable_mosaic.version = 11 : i64} {
  func.func @_mlp_kernel(%arg0: i32, %arg1: memref<16x32xf32, #tpu.memory_space<vmem>>, %arg2: memref<32x64xf32, #tpu.memory_space<vmem>>, %arg3: memref<1x64xf32, #tpu.memory_space<vmem>>, %arg4: memref<64x128xf32, #tpu.memory_space<vmem>>, %arg5: memref<1x128xf32, #tpu.memory_space<vmem>>, %arg6: memref<16x128xf32, #tpu.memory_space<vmem>>) attributes {dimension_semantics = [#tpu.dimension_semantics<parallel>], iteration_bounds = array<i64: 1>, scalar_prefetch = 0 : i64, scratch_operands = 0 : i64, tpu.core_type = #tpu.core_type<tc>, window_params = [{transform_indices = @transform_0, window_bounds = array<i64: 16, 32>}, {pipeline_mode = #tpu.pipeline_mode<synchronous>, transform_indices = @transform_1, window_bounds = array<i64: 32, 64>}, {pipeline_mode = #tpu.pipeline_mode<synchronous>, transform_indices = @transform_2, window_bounds = array<i64: 1, 64>}, {pipeline_mode = #tpu.pipeline_mode<synchronous>, transform_indices = @transform_3, window_bounds = array<i64: 64, 128>}, {pipeline_mode = #tpu.pipeline_mode<synchronous>, transform_indices = @transform_4, window_bounds = array<i64: 1, 128>}, {transform_indices = @transform_5, window_bounds = array<i64: 16, 128>}]} {
    %c0 = arith.constant 0 : index
    %c0_0 = arith.constant 0 : index
    %0 = vector.load %arg1[%c0, %c0_0] : memref<16x32xf32, #tpu.memory_space<vmem>>, vector<16x32xf32>
    %c0_1 = arith.constant 0 : index
    %c0_2 = arith.constant 0 : index
    %1 = vector.load %arg2[%c0_1, %c0_2] : memref<32x64xf32, #tpu.memory_space<vmem>>, vector<32x64xf32>
    %cst = arith.constant dense<0.000000e+00> : vector<16x64xf32>
    %2 = tpu.matmul %0, %1, %cst {dimension_numbers = #tpu.dot_dimension_numbers<[1], [0], [0], [1], [0, 0, 1, 1], [], []>} : vector<16x32xf32>, vector<32x64xf32>, vector<16x64xf32> -> vector<16x64xf32>
    %c0_3 = arith.constant 0 : index
    %c0_4 = arith.constant 0 : index
    %3 = vector.load %arg3[%c0_3, %c0_4] : memref<1x64xf32, #tpu.memory_space<vmem>>, vector<1x64xf32>
    %4 = vector.broadcast %3 : vector<1x64xf32> to vector<16x64xf32>
    %5 = arith.addf %2, %4 : vector<16x64xf32>
    %cst_5 = arith.constant 5.000000e-01 : f32
    %6 = vector.broadcast %cst_5 : f32 to vector<16x64xf32>
    %7 = arith.mulf %6, %5 : vector<16x64xf32>
    %cst_6 = arith.constant 0.707106769 : f32
    %8 = vector.broadcast %cst_6 : f32 to vector<16x64xf32>
    %9 = arith.mulf %5, %8 : vector<16x64xf32>
    %10 = math.erf %9 : vector<16x64xf32>
    %cst_7 = arith.constant 1.000000e+00 : f32
    %11 = vector.broadcast %cst_7 : f32 to vector<16x64xf32>
    %12 = arith.addf %11, %10 : vector<16x64xf32>
    %13 = arith.mulf %7, %12 : vector<16x64xf32>
    %c0_8 = arith.constant 0 : index
    %c0_9 = arith.constant 0 : index
    %14 = vector.load %arg4[%c0_8, %c0_9] : memref<64x128xf32, #tpu.memory_space<vmem>>, vector<64x128xf32>
    %cst_10 = arith.constant dense<0.000000e+00> : vector<16x128xf32>
    %15 = tpu.matmul %13, %14, %cst_10 {dimension_numbers = #tpu.dot_dimension_numbers<[1], [0], [0], [1], [0, 0, 1, 1], [], []>} : vector<16x64xf32>, vector<64x128xf32>, vector<16x128xf32> -> vector<16x128xf32>
    %c0_11 = arith.constant 0 : index
    %c0_12 = arith.constant 0 : index
    %16 = vector.load %arg5[%c0_11, %c0_12] : memref<1x128xf32, #tpu.memory_space<vmem>>, vector<1x128xf32>
    %17 = vector.broadcast %16 : vector<1x128xf32> to vector<16x128xf32>
    %18 = arith.addf %15, %17 : vector<16x128xf32>
    %c0_13 = arith.constant 0 : index
    %c0_14 = arith.constant 0 : index
    %19 = vector.load %arg6[%c0_13, %c0_14] : memref<16x128xf32, #tpu.memory_space<vmem>>, vector<16x128xf32>
    tpu.vector_store %arg6[%c0_13, %c0_14], %18 {strides = array<i32>} : memref<16x128xf32, #tpu.memory_space<vmem>>, vector<16x128xf32>,
    return
  }
  func.func @transform_0(%arg0: i32) -> (i32, i32) {
    %c0_i32 = arith.constant 0 : i32
    %c0_i32_0 = arith.constant 0 : i32
    return %arg0, %c0_i32 : i32, i32
  }
  func.func @transform_1(%arg0: i32) -> (i32, i32) {
    %c0_i32 = arith.constant 0 : i32
    %c0_i32_0 = arith.constant 0 : i32
    %c0_i32_1 = arith.constant 0 : i32
    return %c0_i32, %c0_i32_0 : i32, i32
  }
  func.func @transform_2(%arg0: i32) -> (i32, i32) {
    %c0_i32 = arith.constant 0 : i32
    %c0_i32_0 = arith.constant 0 : i32
    %c0_i32_1 = arith.constant 0 : i32
    return %c0_i32, %c0_i32_0 : i32, i32
  }
  func.func @transform_3(%arg0: i32) -> (i32, i32) {
    %c0_i32 = arith.constant 0 : i32
    %c0_i32_0 = arith.constant 0 : i32
    %c0_i32_1 = arith.constant 0 : i32
    return %c0_i32, %c0_i32_0 : i32, i32
  }
  func.func @transform_4(%arg0: i32) -> (i32, i32) {
    %c0_i32 = arith.constant 0 : i32
    %c0_i32_0 = arith.constant 0 : i32
    %c0_i32_1 = arith.constant 0 : i32
    return %c0_i32, %c0_i32_0 : i32, i32
  }
  func.func @transform_5(%arg0: i32) -> (i32, i32) {
    %c0_i32 = arith.constant 0 : i32
    %c0_i32_0 = arith.constant 0 : i32
    return %arg0, %c0_i32 : i32, i32
  }
}

module attributes {stable_mosaic.version = 11 : i64} {
  func.func @_mlp_kernel(%arg0: i32, %arg1: memref<16x32xf32, #tpu.memory_space<vmem>>, %arg2: memref<32x64xf32, #tpu.memory_space<vmem>>, %arg3: memref<1x64xf32, #tpu.memory_space<vmem>>, %arg4: memref<64x128xf32, #tpu.memory_space<vmem>>, %arg5: memref<1x128xf32, #tpu.memory_space<vmem>>, %arg6: memref<16x128xf32, #tpu.memory_space<vmem>>) attributes {dimension_semantics = [#tpu.dimension_semantics<parallel>], iteration_bounds = array<i64: 1>, scalar_prefetch = 0 : i64, scratch_operands = 0 : i64, tpu.core_type = #tpu.core_type<tc>, window_params = [{transform_indices = @transform_0, window_bounds = array<i64: 16, 32>}, {pipeline_mode = #tpu.pipeline_mode<synchronous>, transform_indices = @transform_1, window_bounds = array<i64: 32, 64>}, {pipeline_mode = #tpu.pipeline_mode<synchronous>, transform_indices = @transform_2, window_bounds = array<i64: 1, 64>}, {pipeline_mode = #tpu.pipeline_mode<synchronous>, transform_indices = @transform_3, window_bounds = array<i64: 64, 128>}, {pipeline_mode = #tpu.pipeline_mode<synchronous>, transform_indices = @transform_4, window_bounds = array<i64: 1, 128>}, {transform_indices = @transform_5, window_bounds = array<i64: 16, 128>}]} {
    %c0 = arith.constant 0 : index
    %c0_0 = arith.constant 0 : index
    %0 = vector.load %arg1[%c0, %c0_0] : memref<16x32xf32, #tpu.memory_space<vmem>>, vector<16x32xf32>
    %c0_1 = arith.constant 0 : index
    %c0_2 = arith.constant 0 : index
    %1 = vector.load %arg2[%c0_1, %c0_2] : memref<32x64xf32, #tpu.memory_space<vmem>>, vector<32x64xf32>
    %cst = arith.constant dense<0.000000e+00> : vector<16x64xf32>
    %2 = tpu.matmul %0, %1, %cst {dimension_numbers = #tpu.dot_dimension_numbers<[1], [0], [0], [1], [0, 0, 1, 1], [], []>} : vector<16x32xf32>, vector<32x64xf32>, vector<16x64xf32> -> vector<16x64xf32>
    %c0_3 = arith.constant 0 : index
    %c0_4 = arith.constant 0 : index
    %3 = vector.load %arg3[%c0_3, %c0_4] : memref<1x64xf32, #tpu.memory_space<vmem>>, vector<1x64xf32>
    %4 = vector.broadcast %3 : vector<1x64xf32> to vector<16x64xf32>
    %5 = arith.addf %2, %4 : vector<16x64xf32>
    %cst_5 = arith.constant 5.000000e-01 : f32
    %6 = vector.broadcast %cst_5 : f32 to vector<16x64xf32>
    %7 = arith.mulf %6, %5 : vector<16x64xf32>
    %cst_6 = arith.constant 0.707106769 : f32
    %8 = vector.broadcast %cst_6 : f32 to vector<16x64xf32>
    %9 = arith.mulf %5, %8 : vector<16x64xf32>
    %10 = math.erf %9 : vector<16x64xf32>
    %cst_7 = arith.constant 1.000000e+00 : f32
    %11 = vector.broadcast %cst_7 : f32 to vector<16x64xf32>
    %12 = arith.addf %11, %10 : vector<16x64xf32>
    %13 = arith.mulf %7, %12 : vector<16x64xf32>
    %c0_8 = arith.constant 0 : index
    %c0_9 = arith.constant 0 : index
    %14 = vector.load %arg4[%c0_8, %c0_9] : memref<64x128xf32, #tpu.memory_space<vmem>>, vector<64x128xf32>
    %cst_10 = arith.constant dense<0.000000e+00> : vector<16x128xf32>
    %15 = tpu.matmul %13, %14, %cst_10 {dimension_numbers = #tpu.dot_dimension_numbers<[1], [0], [0], [1], [0, 0, 1, 1], [], []>} : vector<16x64xf32>, vector<64x128xf32>, vector<16x128xf32> -> vector<16x128xf32>
    %c0_11 = arith.constant 0 : index
    %c0_12 = arith.constant 0 : index
    %16 = vector.load %arg5[%c0_11, %c0_12] : memref<1x128xf32, #tpu.memory_space<vmem>>, vector<1x128xf32>
    %17 = vector.broadcast %16 : vector<1x128xf32> to vector<16x128xf32>
    %18 = arith.addf %15, %17 : vector<16x128xf32>
    %c0_13 = arith.constant 0 : index
    %c0_14 = arith.constant 0 : index
    %19 = vector.load %arg6[%c0_13, %c0_14] : memref<16x128xf32, #tpu.memory_space<vmem>>, vector<16x128xf32>
    tpu.vector_store %arg6[%c0_13, %c0_14], %18 {strides = array<i32>} : memref<16x128xf32, #tpu.memory_space<vmem>>, vector<16x128xf32>,
    return
  }
  func.func @transform_0(%arg0: i32) -> (i32, i32) {
    %c0_i32 = arith.constant 0 : i32
    %c0_i32_0 = arith.constant 0 : i32
    return %arg0, %c0_i32 : i32, i32
  }
  func.func @transform_1(%arg0: i32) -> (i32, i32) {
    %c0_i32 = arith.constant 0 : i32
    %c0_i32_0 = arith.constant 0 : i32
    %c0_i32_1 = arith.constant 0 : i32
    return %c0_i32, %c0_i32_0 : i32, i32
  }
  func.func @transform_2(%arg0: i32) -> (i32, i32) {
    %c0_i32 = arith.constant 0 : i32
    %c0_i32_0 = arith.constant 0 : i32
    %c0_i32_1 = arith.constant 0 : i32
    return %c0_i32, %c0_i32_0 : i32, i32
  }
  func.func @transform_3(%arg0: i32) -> (i32, i32) {
    %c0_i32 = arith.constant 0 : i32
    %c0_i32_0 = arith.constant 0 : i32
    %c0_i32_1 = arith.constant 0 : i32
    return %c0_i32, %c0_i32_0 : i32, i32
  }
  func.func @transform_4(%arg0: i32) -> (i32, i32) {
    %c0_i32 = arith.constant 0 : i32
    %c0_i32_0 = arith.constant 0 : i32
    %c0_i32_1 = arith.constant 0 : i32
    return %c0_i32, %c0_i32_0 : i32, i32
  }
  func.func @transform_5(%arg0: i32) -> (i32, i32) {
    %c0_i32 = arith.constant 0 : i32
    %c0_i32_0 = arith.constant 0 : i32
    return %arg0, %c0_i32 : i32, i32
  }
}

</mosaic_0001>

<bundles_post_ra>
// kernel: _mlp_pallas.1
= control target key start
LH: loop header
LB: loop body
LE: loop exit
PB: predicated region body
PF: predicated region fallthrough
CT: control target
= control target key end

     0   :  { %vm33_vm0 = vcmask 261120   ;;  %vm140_vm1 = vcmask 523264   ;;  %s392_s1 = inlined_call_operand.vmem [shape: f32[32,64], index: 1, kind: input, shape index: {}]   ;;  %s393_s0 = inlined_call_operand.vmem [shape: f32[16,32], index: 0, kind: input, shape index: {}]   ;;  %s394_s3 = inlined_call_operand.vmem [shape: f32[64,128], index: 3, kind: input, shape index: {}]   ;;  %s395_s2 = inlined_call_operand.vmem [shape: f32[1,64], index: 2, kind: input, shape index: {}]   ;;  %s396_s4 = inlined_call_operand.vmem [shape: f32[1,128], index: 4, kind: input, shape index: {}]   ;;  %s397_s5 = inlined_call_operand.vmem [shape: f32[16,128], index: 5, kind: output, shape index: {}]  }
   0x1   :  { %v22_v0 = vld [vmem:[%s392_s1] sm:$0xff]  ;;  %v23_v1 = vld [vmem:[%s392_s1 + $0x8] sm:$0xff]  ;;  %v24_v2 = vld [vmem:[%s392_s1 + $0x10] sm:$0xff] }
   0x2   :  { %v280_v3 = vpack.c.bf16 %v23_v1, %v22_v0  ;;  %v25_v4 = vld [vmem:[%s392_s1 + $0x18] sm:$0xff]  ;;  %v20_v5 = vld [vmem:[%s393_s0] sm:$0xff]  ;;  %v21_v7 = vld [vmem:[%s393_s0 + $0x8] sm:$0xff] }
   0x3   :  { %v284_v6 = vpack.c.bf16 %v25_v4, %v24_v2  ;;  %258 = vmatprep.mubr.msk.f32.mxu0 %vm33_vm0, %v20_v5  ;;  %v125_v8 = vld [vmem:[%s394_s3] sm:$0xff]  ;;  %v126_v9 = vld [vmem:[%s394_s3 + $0x8] sm:$0xff]  ;;  %v127_v11 = vld [vmem:[%s394_s3 + $0x10] sm:$0xff] }
   0x4   :  { %281 = vmatprep.subr.bf16.mxu0 %v280_v3  ;;  %v288_v10 = vpack.c.bf16 %v126_v9, %v125_v8  ;;  %v128_v12 = vld [vmem:[%s394_s3 + $0x18] sm:$0xff]  ;;  %v129_v14 = vld [vmem:[%s394_s3 + $0x20] sm:$0xff]  ;;  %v130_v15 = vld [vmem:[%s394_s3 + $0x28] sm:$0xff] }
   0x5   :  { %283 = vmatpush3.bf16.msra.mxu0 %v280_v3  ;;  %v292_v13 = vpack.c.bf16 %v128_v12, %v127_v11  ;;  %v296_v16 = vpack.c.bf16 %v130_v15, %v129_v14  ;;  %v131_v17 = vld [vmem:[%s394_s3 + $0x30] sm:$0xff]  ;;  %v132_v18 = vld [vmem:[%s394_s3 + $0x38] sm:$0xff]  ;;  %v228_v20 = vld [vmem:[%s395_s2] ss:$0 sm:$0xff] }
   0x6   :  { %285 = vmatprep.subr.bf16.mxu0 %v284_v6  ;;  %289 = vmatprep.subr.bf16.mxu1 %v288_v10  ;;  %v300_v19 = vpack.c.bf16 %v132_v18, %v131_v17  ;;  %v231_v35 = vld [vmem:[%s396_s4] ss:$0 sm:$0xff] }
   0x7   :  { %291 = vmatpush3.bf16.msra.mxu1 %v288_v10 }
   0x8   :  { %293 = vmatprep.subr.bf16.mxu1 %v292_v13 }
   0x9   :  { %287 = vmatpush3.bf16.msra.mxu0 %v284_v6 }
   0xb   :  { %295 = vmatpush3.bf16.msra.mxu1 %v292_v13 }
   0xc   :  { %259 = vmatmul.mubr.msk.f32.vlgmr.msra.gmra.mrb[0].mxu0 %vm33_vm0, %v21_v7  ;;  %297 = vmatprep.subr.bf16.mxu1 %v296_v16 }
   0xf   :  { %299 = vmatpush3.bf16.msra.mxu1 %v296_v16 }
  0x10   :  { %301 = vmatprep.subr.bf16.mxu1 %v300_v19 }
  0x13   :  { %303 = vmatpush3.bf16.msra.mxu1 %v300_v19 }
  0xdf   :  { %v260_v21 = vpop.f32.mrb[0].mxu0 }
  0xe0   :  { %v112_v22 = vadd.f32 %v260_v21, %v228_v20  ;;  %v106_v23 = vpop.f32.mrb[1].mxu0 }
  0xe1   :  { %v107_v24 = vadd.f32 %v228_v20, %v106_v23 }
  0xe2   :  { %v118_v25 = vmul.f32 0.70710677, %v112_v22  ;;  %v116_v32 = vmul.f32 0.5, %v112_v22 }
  0xe3   :  { %v117_v26 = vmul.f32 0.70710677, %v107_v24  ;;  %v115_v30 = vmul.f32 0.5, %v107_v24 }
  0xe4   :  { %304 = verf.f32 %v118_v25 }
  0xe5   :  { %306 = verf.f32 %v117_v26 }
  0xee   :  { %v305_v27 = vpop.eup %304 }
  0xef   :  { %v307_v28 = vpop.eup %306  ;;  %v122_v29 = vadd.f32 1.0, %v305_v27 }
  0xf0   :  { %v121_v31 = vadd.f32 1.0, %v307_v28 }
  0xf1   :  { %v124_v34 = vmul.f32 %v122_v29, %v116_v32 }
  0xf2   :  { %v123_v33 = vmul.f32 %v121_v31, %v115_v30 }
  0xf4   :  { %277 = vmatprep.mubr.msk.f32.mxu1 %vm140_vm1, %v123_v33 }
  0xf5   :  { %278 = vmatmul.mubr.msk.f32.vlgmr.msra.gmra.mrb[0].mxu1 %vm140_vm1, %v124_v34 }
 0x1c8   :  { %v279_v36 = vpop.f32.mrb[0].mxu1 }
 0x1c9   :  { %v219_v37 = vadd.f32 %v279_v36, %v231_v35  ;;  %v213_v38 = vpop.f32.mrb[1].mxu1 }
 0x1ca   :  { %v214_v39 = vadd.f32 %v231_v35, %v213_v38 }
 0x1cb   :  { %223 = vst [vmem:[%s397_s5 + $0x8] sm:$0xff] %v219_v37 }
 0x1cc   :  { %222 = vst [vmem:[%s397_s5] sm:$0xff] %v214_v39 }

// kernel: _mlp_pallas.1
= control target key start
LH: loop header
LB: loop body
LE: loop exit
PB: predicated region body
PF: predicated region fallthrough
CT: control target
= control target key end

     0   :  { %vm33_vm0 = vcmask 261120   ;;  %vm140_vm1 = vcmask 523264   ;;  %s392_s1 = inlined_call_operand.vmem [shape: f32[32,64], index: 1, kind: input, shape index: {}]   ;;  %s393_s0 = inlined_call_operand.vmem [shape: f32[16,32], index: 0, kind: input, shape index: {}]   ;;  %s394_s3 = inlined_call_operand.vmem [shape: f32[64,128], index: 3, kind: input, shape index: {}]   ;;  %s395_s2 = inlined_call_operand.vmem [shape: f32[1,64], index: 2, kind: input, shape index: {}]   ;;  %s396_s4 = inlined_call_operand.vmem [shape: f32[1,128], index: 4, kind: input, shape index: {}]   ;;  %s397_s5 = inlined_call_operand.vmem [shape: f32[16,128], index: 5, kind: output, shape index: {}]  }
   0x1   :  { %v22_v0 = vld [vmem:[%s392_s1] sm:$0xff]  ;;  %v23_v1 = vld [vmem:[%s392_s1 + $0x8] sm:$0xff]  ;;  %v24_v2 = vld [vmem:[%s392_s1 + $0x10] sm:$0xff] }
   0x2   :  { %v280_v3 = vpack.c.bf16 %v23_v1, %v22_v0  ;;  %v25_v4 = vld [vmem:[%s392_s1 + $0x18] sm:$0xff]  ;;  %v20_v5 = vld [vmem:[%s393_s0] sm:$0xff]  ;;  %v21_v7 = vld [vmem:[%s393_s0 + $0x8] sm:$0xff] }
   0x3   :  { %v284_v6 = vpack.c.bf16 %v25_v4, %v24_v2  ;;  %258 = vmatprep.mubr.msk.f32.mxu0 %vm33_vm0, %v20_v5  ;;  %v125_v8 = vld [vmem:[%s394_s3] sm:$0xff]  ;;  %v126_v9 = vld [vmem:[%s394_s3 + $0x8] sm:$0xff]  ;;  %v127_v11 = vld [vmem:[%s394_s3 + $0x10] sm:$0xff] }
   0x4   :  { %281 = vmatprep.subr.bf16.mxu0 %v280_v3  ;;  %v288_v10 = vpack.c.bf16 %v126_v9, %v125_v8  ;;  %v128_v12 = vld [vmem:[%s394_s3 + $0x18] sm:$0xff]  ;;  %v129_v14 = vld [vmem:[%s394_s3 + $0x20] sm:$0xff]  ;;  %v130_v15 = vld [vmem:[%s394_s3 + $0x28] sm:$0xff] }
   0x5   :  { %283 = vmatpush3.bf16.msra.mxu0 %v280_v3  ;;  %v292_v13 = vpack.c.bf16 %v128_v12, %v127_v11  ;;  %v296_v16 = vpack.c.bf16 %v130_v15, %v129_v14  ;;  %v131_v17 = vld [vmem:[%s394_s3 + $0x30] sm:$0xff]  ;;  %v132_v18 = vld [vmem:[%s394_s3 + $0x38] sm:$0xff]  ;;  %v228_v20 = vld [vmem:[%s395_s2] ss:$0 sm:$0xff] }
   0x6   :  { %285 = vmatprep.subr.bf16.mxu0 %v284_v6  ;;  %289 = vmatprep.subr.bf16.mxu1 %v288_v10  ;;  %v300_v19 = vpack.c.bf16 %v132_v18, %v131_v17  ;;  %v231_v35 = vld [vmem:[%s396_s4] ss:$0 sm:$0xff] }
   0x7   :  { %291 = vmatpush3.bf16.msra.mxu1 %v288_v10 }
   0x8   :  { %293 = vmatprep.subr.bf16.mxu1 %v292_v13 }
   0x9   :  { %287 = vmatpush3.bf16.msra.mxu0 %v284_v6 }
   0xb   :  { %295 = vmatpush3.bf16.msra.mxu1 %v292_v13 }
   0xc   :  { %259 = vmatmul.mubr.msk.f32.vlgmr.msra.gmra.mrb[0].mxu0 %vm33_vm0, %v21_v7  ;;  %297 = vmatprep.subr.bf16.mxu1 %v296_v16 }
   0xf   :  { %299 = vmatpush3.bf16.msra.mxu1 %v296_v16 }
  0x10   :  { %301 = vmatprep.subr.bf16.mxu1 %v300_v19 }
  0x13   :  { %303 = vmatpush3.bf16.msra.mxu1 %v300_v19 }
  0xdf   :  { %v260_v21 = vpop.f32.mrb[0].mxu0 }
  0xe0   :  { %v112_v22 = vadd.f32 %v260_v21, %v228_v20  ;;  %v106_v23 = vpop.f32.mrb[1].mxu0 }
  0xe1   :  { %v107_v24 = vadd.f32 %v228_v20, %v106_v23 }
  0xe2   :  { %v118_v25 = vmul.f32 0.70710677, %v112_v22  ;;  %v116_v32 = vmul.f32 0.5, %v112_v22 }
  0xe3   :  { %v117_v26 = vmul.f32 0.70710677, %v107_v24  ;;  %v115_v30 = vmul.f32 0.5, %v107_v24 }
  0xe4   :  { %304 = verf.f32 %v118_v25 }
  0xe5   :  { %306 = verf.f32 %v117_v26 }
  0xee   :  { %v305_v27 = vpop.eup %304 }
  0xef   :  { %v307_v28 = vpop.eup %306  ;;  %v122_v29 = vadd.f32 1.0, %v305_v27 }
  0xf0   :  { %v121_v31 = vadd.f32 1.0, %v307_v28 }
  0xf1   :  { %v124_v34 = vmul.f32 %v122_v29, %v116_v32 }
  0xf2   :  { %v123_v33 = vmul.f32 %v121_v31, %v115_v30 }
  0xf4   :  { %277 = vmatprep.mubr.msk.f32.mxu1 %vm140_vm1, %v123_v33 }
  0xf5   :  { %278 = vmatmul.mubr.msk.f32.vlgmr.msra.gmra.mrb[0].mxu1 %vm140_vm1, %v124_v34 }
 0x1c8   :  { %v279_v36 = vpop.f32.mrb[0].mxu1 }
 0x1c9   :  { %v219_v37 = vadd.f32 %v279_v36, %v231_v35  ;;  %v213_v38 = vpop.f32.mrb[1].mxu1 }
 0x1ca   :  { %v214_v39 = vadd.f32 %v231_v35, %v213_v38 }
 0x1cb   :  { %223 = vst [vmem:[%s397_s5 + $0x8] sm:$0xff] %v219_v37 }
 0x1cc   :  { %222 = vst [vmem:[%s397_s5] sm:$0xff] %v214_v39 }

</bundles_post_ra>
